<compile_context>
chip_gen: v5e
topology: v5e:2x2
jax: 0.10.0
libtpu: 0.0.40
codegen_flags: <defaults>
</compile_context>

<pallas_src>
import functools

import jax
import jax.numpy as jnp
from jax.experimental import pallas as pl
from jax.experimental.pallas import tpu as pltpu

LANE = 128          # lane-dense padded feature width
BN_EPS = 1e-5       # torch.nn.BatchNorm1d default eps
GIN_EPS = 0.0       # torch_geometric GINConv default eps


def _round_up(x, m):
    return (x + m - 1) // m * m


def gin_fused_kernel(x0_ref, a_hbm_ref,
                     w1_ref, g1_ref, be1_ref,
                     w2_ref, g2_ref, be2_ref,
                     o_ref,
                     a_vmem, carry_ref, dma_sem,
                     *, n_real):
    """One grid step == one GIN layer (grid axis 0 = layer, 'arbitrary').

    carry_ref (bf16 VMEM scratch) holds the layer's input on entry and its
    output on exit; a_vmem holds the single VMEM-resident copy of
    A' = A + (1+eps)*I; the f32 output block is written once, after the
    last layer.
    """
    layer = pl.program_id(0)
    n_pad = carry_ref.shape[0]
    inv_n = 1.0 / float(n_real)

    # Layer 0: DMA A' from HBM into its single-buffered VMEM home (exactly
    # once for the whole kernel) and seed the bf16 carry with the input
    # features while that DMA is in flight.
    @pl.when(layer == 0)
    def _():
        cp = pltpu.make_async_copy(a_hbm_ref, a_vmem, dma_sem.at[0])
        cp.start()
        carry_ref[...] = x0_ref[...]
        cp.wait()

    x = carry_ref[...]                                        # (n_pad, LANE) bf16
    # GINConv aggregation with the folded self term: h = (A + (1+eps) I) @ x.
    h = jnp.dot(a_vmem[...], x, preferred_element_type=jnp.float32)

    def linear_bn_relu(hin_bf16, w_ref, g_ref, be_ref):
        # nn.Linear (bias dropped: cancels under training-mode BatchNorm)
        # -> single-pass BatchNorm1d (batch stats, biased variance, affine
        #    folded into one scale/shift) -> ReLU.
        z = jnp.dot(hin_bf16, w_ref[...], preferred_element_type=jnp.float32)
        mu = jnp.sum(z, axis=0, keepdims=True) * inv_n
        ex2 = jnp.sum(z * z, axis=0, keepdims=True) * inv_n
        var = jnp.maximum(ex2 - mu * mu, 0.0)     # guard f32 cancellation
        scale = g_ref[...] * jax.lax.rsqrt(var + BN_EPS)
        shift = be_ref[...] - mu * scale
        return jnp.maximum(z * scale + shift, 0.0)

    z = linear_bn_relu(h.astype(jnp.bfloat16), w1_ref, g1_ref, be1_ref)
    if n_real != n_pad:
        # Re-zero padded node rows so block-2 BN statistics stay exact.
        row_ok = jax.lax.broadcasted_iota(jnp.int32, (n_pad, LANE), 0) < n_real
        z = jnp.where(row_ok, z, 0.0)
    z = linear_bn_relu(z.astype(jnp.bfloat16), w2_ref, g2_ref, be2_ref)

    carry_ref[...] = z.astype(carry_ref.dtype)                # bf16 carry

    @pl.when(layer == pl.num_programs(0) - 1)
    def _():
        o_ref[...] = z                                        # f32, written once


def init_gin_encoder(key, in_dim, hidden_dim, num_layers, lane=LANE):
    """Stacked per-layer parameters, zero-padded to (lane, lane).

    PyTorch nn.Linear default init U(-1/sqrt(fan_in), 1/sqrt(fan_in)); weights
    are stored pre-transposed (fan_in, fan_out) for x @ W and cast to bf16.
    nn.Linear biases are omitted: under training-mode BatchNorm1d (batch
    statistics, as in the PyTorch reference) they cancel exactly.
    BatchNorm affine: gamma = 1, beta = 0 (PyTorch defaults).
    """
    assert in_dim <= lane and hidden_dim <= lane
    w1s, w2s = [], []
    for layer in range(num_layers):
        d_in = in_dim if layer == 0 else hidden_dim
        key, k1, k2 = jax.random.split(key, 3)
        b1 = 1.0 / float(d_in) ** 0.5
        b2 = 1.0 / float(hidden_dim) ** 0.5
        w1 = jax.random.uniform(k1, (d_in, hidden_dim), jnp.float32, -b1, b1)
        w2 = jax.random.uniform(k2, (hidden_dim, hidden_dim), jnp.float32, -b2, b2)
        w1s.append(jnp.zeros((lane, lane), jnp.float32)
                   .at[:d_in, :hidden_dim].set(w1))
        w2s.append(jnp.zeros((lane, lane), jnp.float32)
                   .at[:hidden_dim, :hidden_dim].set(w2))
    return {
        "w1": jnp.stack(w1s).astype(jnp.bfloat16),        # (L, lane, lane)
        "w2": jnp.stack(w2s).astype(jnp.bfloat16),        # (L, lane, lane)
        "g1": jnp.ones((num_layers, 1, lane), jnp.float32),
        "be1": jnp.zeros((num_layers, 1, lane), jnp.float32),
        "g2": jnp.ones((num_layers, 1, lane), jnp.float32),
        "be2": jnp.zeros((num_layers, 1, lane), jnp.float32),
    }


def gin_encoder_forward(x, edge_index, params, hidden_dim):
    """GINEncoder.forward with edge_attr=None, batch=None: final node feats."""
    n, in_dim = x.shape
    num_layers = params["w1"].shape[0]
    n_pad = _round_up(max(n, 1), LANE)     # lane-dense A', MXU-aligned K dim

    # Glue (not hot path): lane/row-pad the input features and build the
    # dense bf16 adjacency with the GIN self term folded in:
    #   A'[dst, src] += 1 ;  A'[i, i] += (1 + eps) for real nodes i.
    x0 = (jnp.zeros((n_pad, LANE), jnp.float32)
          .at[:n, :in_dim].set(x)
          .astype(jnp.bfloat16))
    src, dst = edge_index[0], edge_index[1]
    diag = jnp.arange(n)
    adj = (jnp.zeros((n_pad, n_pad), jnp.float32)
           .at[dst, src].add(1.0)
           .at[diag, diag].add(1.0 + GIN_EPS)
           .astype(jnp.bfloat16))          # exact for per-entry counts <= 256

    resident = lambda l: (0, 0)                    # fetched once, stays in VMEM
    w_spec = pl.BlockSpec((None, LANE, LANE), lambda l: (l, 0, 0))
    v_spec = pl.BlockSpec((None, 1, LANE), lambda l: (l, 0, 0))

    grid_spec = pltpu.PrefetchScalarGridSpec(
        num_scalar_prefetch=0,
        grid=(num_layers,),
        in_specs=[
            pl.BlockSpec((n_pad, LANE), resident),   # x0 (layer-0 seed)
            pl.BlockSpec(memory_space=pl.ANY),       # A' stays in HBM; manual DMA
            w_spec, v_spec, v_spec,                  # W1, gamma1, beta1
            w_spec, v_spec, v_spec,                  # W2, gamma2, beta2
        ],
        out_specs=pl.BlockSpec((n_pad, LANE), resident),
        scratch_shapes=[
            pltpu.VMEM((n_pad, n_pad), jnp.bfloat16),   # single-buffered A'
            pltpu.VMEM((n_pad, LANE), jnp.bfloat16),    # bf16 layer carry
            pltpu.SemaphoreType.DMA((1,)),
        ],
    )

    # VMEM budget from the actual footprint (+25% headroom), not a flat cap.
    # Dense-A' residency ceiling: ~6-7K nodes on v5e/v6e (128 MiB VMEM),
    # ~4-4.5K nodes on v7x (64 MiB) -- see TODOs at the top for the K-tiled
    # streaming path beyond that.
    a_bytes = n_pad * n_pad * 2
    carry_bytes = n_pad * LANE * 2
    x0_bytes = 2 * n_pad * LANE * 2                  # double-buffered input
    out_bytes = 2 * n_pad * LANE * 4                 # output block
    w_bytes = 2 * 2 * 2 * LANE * LANE * 2            # W1+W2, double-buffered, bf16
    vec_bytes = 4 * 2 * LANE * 4
    need = a_bytes + carry_bytes + x0_bytes + out_bytes + w_bytes + vec_bytes
    vmem_limit = min(int(need * 1.25) + (2 << 20), 100 * 1024 * 1024)

    flops = num_layers * (2 * n_pad * n_pad * LANE + 2 * 2 * n_pad * LANE * LANE)
    bytes_accessed = (x0.size * 2 + adj.size * 2
                      + params["w1"].size * 2 + params["w2"].size * 2
                      + (params["g1"].size + params["be1"].size
                         + params["g2"].size + params["be2"].size) * 4
                      + n_pad * LANE * 4)
    cost = pl.CostEstimate(flops=flops,
                           transcendentals=num_layers * 2 * LANE,
                           bytes_accessed=bytes_accessed)

    out = pl.pallas_call(
        functools.partial(gin_fused_kernel, n_real=n),
        out_shape=jax.ShapeDtypeStruct((n_pad, LANE), jnp.float32),
        grid_spec=grid_spec,
        compiler_params=pltpu.CompilerParams(
            dimension_semantics=("arbitrary",),      # layer carry is sequential
            vmem_limit_bytes=vmem_limit,
        ),
        cost_estimate=cost,
    )(x0, adj,
      params["w1"], params["g1"], params["be1"],
      params["w2"], params["g2"], params["be2"])

    return out[:n, :hidden_dim]   # drop padding (x_skip == x when batch=None)


if __name__ == "__main__":
    N, IN_DIM, HIDDEN, NUM_LAYERS, E = 32, 16, 32, 4, 64

    key = jax.random.PRNGKey(0)
    k_x, k_src, k_dst, k_params = jax.random.split(key, 4)

    x = jax.random.normal(k_x, (N, IN_DIM), jnp.float32)
    src = jax.random.randint(k_src, (E,), 0, N, jnp.int32)
    dst = jax.random.randint(k_dst, (E,), 0, N, jnp.int32)
    edge_index = jnp.stack([src, dst], axis=0)   # (2, E)

    params = init_gin_encoder(k_params, IN_DIM, HIDDEN, NUM_LAYERS)

    out = gin_encoder_forward(x, edge_index, params, HIDDEN)
    out = jax.block_until_ready(out)
    assert out.shape == (N, HIDDEN)
    assert bool(jnp.all(jnp.isfinite(out)))
    print("KERNEL_OK")
</pallas_src>

<mosaic_0001>
module attributes {stable_mosaic.version = 11 : i64} {
  func.func @gin_fused_kernel(%arg0: i32, %arg1: memref<128x128xbf16, #tpu.memory_space<vmem>>, %arg2: memref<128x128xbf16, #tpu.memory_space<any>>, %arg3: memref<1x128x128xbf16, #tpu.memory_space<vmem>>, %arg4: memref<1x1x128xf32, #tpu.memory_space<vmem>>, %arg5: memref<1x1x128xf32, #tpu.memory_space<vmem>>, %arg6: memref<1x128x128xbf16, #tpu.memory_space<vmem>>, %arg7: memref<1x1x128xf32, #tpu.memory_space<vmem>>, %arg8: memref<1x1x128xf32, #tpu.memory_space<vmem>>, %arg9: memref<128x128xf32, #tpu.memory_space<vmem>>, %arg10: memref<128x128xbf16, #tpu.memory_space<vmem>>, %arg11: memref<128x128xbf16, #tpu.memory_space<vmem>>, %arg12: memref<1x!tpu.dma_semaphore, #tpu.memory_space<semaphore_mem>>) attributes {dimension_semantics = [#tpu.dimension_semantics<arbitrary>], iteration_bounds = array<i64: 4>, scalar_prefetch = 0 : i64, scratch_operands = 3 : i64, tpu.core_type = #tpu.core_type<tc>, window_params = [{pipeline_mode = #tpu.pipeline_mode<synchronous>, transform_indices = @transform_0, window_bounds = array<i64: 128, 128>}, {}, {transform_indices = @transform_2, window_bounds = array<i64: 1, 128, 128>}, {transform_indices = @transform_3, window_bounds = array<i64: 1, 1, 128>}, {transform_indices = @transform_4, window_bounds = array<i64: 1, 1, 128>}, {transform_indices = @transform_5, window_bounds = array<i64: 1, 128, 128>}, {transform_indices = @transform_6, window_bounds = array<i64: 1, 1, 128>}, {transform_indices = @transform_7, window_bounds = array<i64: 1, 1, 128>}, {pipeline_mode = #tpu.pipeline_mode<synchronous>, transform_indices = @transform_8, window_bounds = array<i64: 128, 128>}]} {
    %c0_i32 = arith.constant 0 : i32
    %0 = arith.cmpi eq, %arg0, %c0_i32 : i32
    %1 = arith.extui %0 : i1 to i32
    %c0_i32_0 = arith.constant 0 : i32
    %2 = arith.cmpi ne, %1, %c0_i32_0 : i32
    scf.if %2 {
      %c0_i32_42 = arith.constant 0 : i32
      %82 = tpu.memref_slice %arg12[%c0_i32_42] : memref<1x!tpu.dma_semaphore, #tpu.memory_space<semaphore_mem>> -> memref<1x!tpu.dma_semaphore, #tpu.memory_space<semaphore_mem>>
      %83 = tpu.memref_squeeze %82 : memref<1x!tpu.dma_semaphore, #tpu.memory_space<semaphore_mem>> -> memref<!tpu.dma_semaphore, #tpu.memory_space<semaphore_mem>>
      tpu.enqueue_dma source(%arg2 : memref<128x128xbf16, #tpu.memory_space<any>>) target(%arg10 : memref<128x128xbf16, #tpu.memory_space<vmem>>) target_semaphore(%83 : memref<!tpu.dma_semaphore, #tpu.memory_space<semaphore_mem>>)
      %c0_43 = arith.constant 0 : index
      %c0_44 = arith.constant 0 : index
      %84 = vector.load %arg1[%c0_43, %c0_44] : memref<128x128xbf16, #tpu.memory_space<vmem>>, vector<128x128xbf16>
      %c0_45 = arith.constant 0 : index
      %c0_46 = arith.constant 0 : index
      %85 = vector.load %arg11[%c0_45, %c0_46] : memref<128x128xbf16, #tpu.memory_space<vmem>>, vector<128x128xbf16>
      tpu.vector_store %arg11[%c0_45, %c0_46], %84 {strides = array<i32>} : memref<128x128xbf16, #tpu.memory_space<vmem>>, vector<128x128xbf16>,
      %c0_i32_47 = arith.constant 0 : i32
      %86 = tpu.memref_slice %arg12[%c0_i32_47] : memref<1x!tpu.dma_semaphore, #tpu.memory_space<semaphore_mem>> -> memref<1x!tpu.dma_semaphore, #tpu.memory_space<semaphore_mem>>
      %87 = tpu.memref_squeeze %86 : memref<1x!tpu.dma_semaphore, #tpu.memory_space<semaphore_mem>> -> memref<!tpu.dma_semaphore, #tpu.memory_space<semaphore_mem>>
      tpu.wait_dma2 semaphore(%87 : memref<!tpu.dma_semaphore, #tpu.memory_space<semaphore_mem>>) src(%arg2 : memref<128x128xbf16, #tpu.memory_space<any>>) dst(%arg10 : memref<128x128xbf16, #tpu.memory_space<vmem>>)
    } else {
    }
    %c0 = arith.constant 0 : index
    %c0_1 = arith.constant 0 : index
    %3 = vector.load %arg11[%c0, %c0_1] : memref<128x128xbf16, #tpu.memory_space<vmem>>, vector<128x128xbf16>
    %c0_2 = arith.constant 0 : index
    %c0_3 = arith.constant 0 : index
    %4 = vector.load %arg10[%c0_2, %c0_3] : memref<128x128xbf16, #tpu.memory_space<vmem>>, vector<128x128xbf16>
    %cst = arith.constant dense<0.000000e+00> : vector<128x128xf32>
    %5 = tpu.matmul %4, %3, %cst {dimension_numbers = #tpu.dot_dimension_numbers<[1], [0], [0], [1], [0, 0, 1, 1], [], []>} : vector<128x128xbf16>, vector<128x128xbf16>, vector<128x128xf32> -> vector<128x128xf32>
    %6 = arith.truncf %5 : vector<128x128xf32> to vector<128x128xbf16>
    %c0_4 = arith.constant 0 : index
    %c0_5 = arith.constant 0 : index
    %c0_6 = arith.constant 0 : index
    %7 = vector.load %arg3[%c0_4, %c0_5, %c0_6] : memref<1x128x128xbf16, #tpu.memory_space<vmem>>, vector<1x128x128xbf16>
    %8 = vector.shape_cast %7 : vector<1x128x128xbf16> to vector<128x128xbf16>
    %cst_7 = arith.constant dense<0.000000e+00> : vector<128x128xf32>
    %9 = tpu.matmul %6, %8, %cst_7 {dimension_numbers = #tpu.dot_dimension_numbers<[1], [0], [0], [1], [0, 0, 1, 1], [], []>} : vector<128x128xbf16>, vector<128x128xbf16>, vector<128x128xf32> -> vector<128x128xf32>
    %cst_8 = arith.constant dense<0.000000e+00> : vector<128xf32>
    %10 = vector.multi_reduction <add>, %9, %cst_8 [0] : vector<128x128xf32> to vector<128xf32>
    %11 = vector.shape_cast %10 : vector<128xf32> to vector<1x128xf32>
    %cst_9 = arith.constant 3.125000e-02 : f32
    %12 = vector.broadcast %cst_9 : f32 to vector<1x128xf32>
    %13 = arith.mulf %11, %12 : vector<1x128xf32>
    %14 = arith.mulf %9, %9 : vector<128x128xf32>
    %cst_10 = arith.constant dense<0.000000e+00> : vector<128xf32>
    %15 = vector.multi_reduction <add>, %14, %cst_10 [0] : vector<128x128xf32> to vector<128xf32>
    %16 = vector.shape_cast %15 : vector<128xf32> to vector<1x128xf32>
    %cst_11 = arith.constant 3.125000e-02 : f32
    %17 = vector.broadcast %cst_11 : f32 to vector<1x128xf32>
    %18 = arith.mulf %16, %17 : vector<1x128xf32>
    %19 = arith.mulf %13, %13 : vector<1x128xf32>
    %20 = arith.subf %18, %19 : vector<1x128xf32>
    %cst_12 = arith.constant 0.000000e+00 : f32
    %21 = vector.broadcast %cst_12 : f32 to vector<1x128xf32>
    %22 = arith.maximumf %20, %21 : vector<1x128xf32>
    %c0_13 = arith.constant 0 : index
    %c0_14 = arith.constant 0 : index
    %c0_15 = arith.constant 0 : index
    %23 = vector.load %arg4[%c0_13, %c0_14, %c0_15] : memref<1x1x128xf32, #tpu.memory_space<vmem>>, vector<1x1x128xf32>
    %24 = vector.shape_cast %23 : vector<1x1x128xf32> to vector<1x128xf32>
    %cst_16 = arith.constant 9.99999974E-6 : f32
    %25 = vector.broadcast %cst_16 : f32 to vector<1x128xf32>
    %26 = arith.addf %22, %25 : vector<1x128xf32>
    %27 = math.rsqrt %26 : vector<1x128xf32>
    %28 = arith.mulf %24, %27 : vector<1x128xf32>
    %c0_17 = arith.constant 0 : index
    %c0_18 = arith.constant 0 : index
    %c0_19 = arith.constant 0 : index
    %29 = vector.load %arg5[%c0_17, %c0_18, %c0_19] : memref<1x1x128xf32, #tpu.memory_space<vmem>>, vector<1x1x128xf32>
    %30 = vector.shape_cast %29 : vector<1x1x128xf32> to vector<1x128xf32>
    %31 = arith.mulf %13, %28 : vector<1x128xf32>
    %32 = arith.subf %30, %31 : vector<1x128xf32>
    %33 = vector.broadcast %28 : vector<1x128xf32> to vector<128x128xf32>
    %34 = arith.mulf %9, %33 : vector<128x128xf32>
    %35 = vector.broadcast %32 : vector<1x128xf32> to vector<128x128xf32>
    %36 = arith.addf %34, %35 : vector<128x128xf32>
    %cst_20 = arith.constant 0.000000e+00 : f32
    %37 = vector.broadcast %cst_20 : f32 to vector<128x128xf32>
    %38 = arith.maximumf %36, %37 : vector<128x128xf32>
    %39 = tpu.iota {dimensions = array<i32: 0>} : vector<128x128xi32>
    %c32_i32 = arith.constant 32 : i32
    %40 = vector.broadcast %c32_i32 : i32 to vector<128x128xi32>
    %41 = arith.cmpi slt, %39, %40 : vector<128x128xi32>
    %cst_21 = arith.constant 0.000000e+00 : f32
    %42 = vector.broadcast %cst_21 : f32 to vector<128x128xf32>
    %43 = arith.select %41, %38, %42 : vector<128x128xi1>, vector<128x128xf32>
    %44 = arith.truncf %43 : vector<128x128xf32> to vector<128x128xbf16>
    %c0_22 = arith.constant 0 : index
    %c0_23 = arith.constant 0 : index
    %c0_24 = arith.constant 0 : index
    %45 = vector.load %arg6[%c0_22, %c0_23, %c0_24] : memref<1x128x128xbf16, #tpu.memory_space<vmem>>, vector<1x128x128xbf16>
    %46 = vector.shape_cast %45 : vector<1x128x128xbf16> to vector<128x128xbf16>
    %cst_25 = arith.constant dense<0.000000e+00> : vector<128x128xf32>
    %47 = tpu.matmul %44, %46, %cst_25 {dimension_numbers = #tpu.dot_dimension_numbers<[1], [0], [0], [1], [0, 0, 1, 1], [], []>} : vector<128x128xbf16>, vector<128x128xbf16>, vector<128x128xf32> -> vector<128x128xf32>
    %cst_26 = arith.constant dense<0.000000e+00> : vector<128xf32>
    %48 = vector.multi_reduction <add>, %47, %cst_26 [0] : vector<128x128xf32> to vector<128xf32>
    %49 = vector.shape_cast %48 : vector<128xf32> to vector<1x128xf32>
    %cst_27 = arith.constant 3.125000e-02 : f32
    %50 = vector.broadcast %cst_27 : f32 to vector<1x128xf32>
    %51 = arith.mulf %49, %50 : vector<1x128xf32>
    %52 = arith.mulf %47, %47 : vector<128x128xf32>
    %cst_28 = arith.constant dense<0.000000e+00> : vector<128xf32>
    %53 = vector.multi_reduction <add>, %52, %cst_28 [0] : vector<128x128xf32> to vector<128xf32>
    %54 = vector.shape_cast %53 : vector<128xf32> to vector<1x128xf32>
    %cst_29 = arith.constant 3.125000e-02 : f32
    %55 = vector.broadcast %cst_29 : f32 to vector<1x128xf32>
    %56 = arith.mulf %54, %55 : vector<1x128xf32>
    %57 = arith.mulf %51, %51 : vector<1x128xf32>
    %58 = arith.subf %56, %57 : vector<1x128xf32>
    %cst_30 = arith.constant 0.000000e+00 : f32
    %59 = vector.broadcast %cst_30 : f32 to vector<1x128xf32>
    %60 = arith.maximumf %58, %59 : vector<1x128xf32>
    %c0_31 = arith.constant 0 : index
    %c0_32 = arith.constant 0 : index
    %c0_33 = arith.constant 0 : index
    %61 = vector.load %arg7[%c0_31, %c0_32, %c0_33] : memref<1x1x128xf32, #tpu.memory_space<vmem>>, vector<1x1x128xf32>
    %62 = vector.shape_cast %61 : vector<1x1x128xf32> to vector<1x128xf32>
    %cst_34 = arith.constant 9.99999974E-6 : f32
    %63 = vector.broadcast %cst_34 : f32 to vector<1x128xf32>
    %64 = arith.addf %60, %63 : vector<1x128xf32>
    %65 = math.rsqrt %64 : vector<1x128xf32>
    %66 = arith.mulf %62, %65 : vector<1x128xf32>
    %c0_35 = arith.constant 0 : index
    %c0_36 = arith.constant 0 : index
    %c0_37 = arith.constant 0 : index
    %67 = vector.load %arg8[%c0_35, %c0_36, %c0_37] : memref<1x1x128xf32, #tpu.memory_space<vmem>>, vector<1x1x128xf32>
    %68 = vector.shape_cast %67 : vector<1x1x128xf32> to vector<1x128xf32>
    %69 = arith.mulf %51, %66 : vector<1x128xf32>
    %70 = arith.subf %68, %69 : vector<1x128xf32>
    %71 = vector.broadcast %66 : vector<1x128xf32> to vector<128x128xf32>
    %72 = arith.mulf %47, %71 : vector<128x128xf32>
    %73 = vector.broadcast %70 : vector<1x128xf32> to vector<128x128xf32>
    %74 = arith.addf %72, %73 : vector<128x128xf32>
    %cst_38 = arith.constant 0.000000e+00 : f32
    %75 = vector.broadcast %cst_38 : f32 to vector<128x128xf32>
    %76 = arith.maximumf %74, %75 : vector<128x128xf32>
    %77 = arith.truncf %76 : vector<128x128xf32> to vector<128x128xbf16>
    %c0_39 = arith.constant 0 : index
    %c0_40 = arith.constant 0 : index
    %78 = vector.load %arg11[%c0_39, %c0_40] : memref<128x128xbf16, #tpu.memory_space<vmem>>, vector<128x128xbf16>
    tpu.vector_store %arg11[%c0_39, %c0_40], %77 {strides = array<i32>} : memref<128x128xbf16, #tpu.memory_space<vmem>>, vector<128x128xbf16>,
    %c3_i32 = arith.constant 3 : i32
    %79 = arith.cmpi eq, %arg0, %c3_i32 : i32
    %80 = arith.extui %79 : i1 to i32
    %c0_i32_41 = arith.constant 0 : i32
    %81 = arith.cmpi ne, %80, %c0_i32_41 : i32
    scf.if %81 {
      %c0_42 = arith.constant 0 : index
      %c0_43 = arith.constant 0 : index
      %82 = vector.load %arg9[%c0_42, %c0_43] : memref<128x128xf32, #tpu.memory_space<vmem>>, vector<128x128xf32>
      tpu.vector_store %arg9[%c0_42, %c0_43], %76 {strides = array<i32>} : memref<128x128xf32, #tpu.memory_space<vmem>>, vector<128x128xf32>,
    } else {
    }
    return
  }
  func.func @transform_0(%arg0: i32) -> (i32, i32) {
    %c0_i32 = arith.constant 0 : i32
    %c0_i32_0 = arith.constant 0 : i32
    %c0_i32_1 = arith.constant 0 : i32
    return %c0_i32, %c0_i32_0 : i32, i32
  }
  func.func @transform_2(%arg0: i32) -> (i32, i32, i32) {
    %c0_i32 = arith.constant 0 : i32
    %c0_i32_0 = arith.constant 0 : i32
    %c0_i32_1 = arith.constant 0 : i32
    return %arg0, %c0_i32, %c0_i32_0 : i32, i32, i32
  }
  func.func @transform_3(%arg0: i32) -> (i32, i32, i32) {
    %c0_i32 = arith.constant 0 : i32
    %c0_i32_0 = arith.constant 0 : i32
    %c0_i32_1 = arith.constant 0 : i32
    return %arg0, %c0_i32, %c0_i32_0 : i32, i32, i32
  }
  func.func @transform_4(%arg0: i32) -> (i32, i32, i32) {
    %c0_i32 = arith.constant 0 : i32
    %c0_i32_0 = arith.constant 0 : i32
    %c0_i32_1 = arith.constant 0 : i32
    return %arg0, %c0_i32, %c0_i32_0 : i32, i32, i32
  }
  func.func @transform_5(%arg0: i32) -> (i32, i32, i32) {
    %c0_i32 = arith.constant 0 : i32
    %c0_i32_0 = arith.constant 0 : i32
    %c0_i32_1 = arith.constant 0 : i32
    return %arg0, %c0_i32, %c0_i32_0 : i32, i32, i32
  }
  func.func @transform_6(%arg0: i32) -> (i32, i32, i32) {
    %c0_i32 = arith.constant 0 : i32
    %c0_i32_0 = arith.constant 0 : i32
    %c0_i32_1 = arith.constant 0 : i32
    return %arg0, %c0_i32, %c0_i32_0 : i32, i32, i32
  }
  func.func @transform_7(%arg0: i32) -> (i32, i32, i32) {
    %c0_i32 = arith.constant 0 : i32
    %c0_i32_0 = arith.constant 0 : i32
    %c0_i32_1 = arith.constant 0 : i32
    return %arg0, %c0_i32, %c0_i32_0 : i32, i32, i32
  }
  func.func @transform_8(%arg0: i32) -> (i32, i32) {
    %c0_i32 = arith.constant 0 : i32
    %c0_i32_0 = arith.constant 0 : i32
    %c0_i32_1 = arith.constant 0 : i32
    return %c0_i32, %c0_i32_0 : i32, i32
  }
}

</mosaic_0001>

<bundles_post_ra>
// kernel: tpu_custom_call.1
= control target key start
LH: loop header
LB: loop body
LE: loop exit
PB: predicated region body
PF: predicated region fallthrough
CT: control target
= control target key end

     0   :  { %s2519_s0 = inlined_call_operand.hbm [shape: bf16[128,128], index: 0, kind: input, shape index: {}]   ;;  %s2520_s1 = inlined_call_operand.hbm [shape: bf16[128,128], index: 1, kind: input, shape index: {}]   ;;  %s2521_s2 = inlined_call_operand.hbm [shape: bf16[4,128,128], index: 2, kind: input, shape index: {}]   ;;  %s2522_s3 = inlined_call_operand.hbm [shape: f32[4,1,128], index: 3, kind: input, shape index: {}]   ;;  %s2523_s4 = inlined_call_operand.hbm [shape: f32[4,1,128], index: 4, kind: input, shape index: {}]   ;;  %s2524_s5 = inlined_call_operand.hbm [shape: bf16[4,128,128], index: 5, kind: input, shape index: {}]   ;;  %s2525_s6 = inlined_call_operand.vmem [shape: f32[4,1,128], index: 6, kind: input, shape index: {}]   ;;  %s2526_s7 = inlined_call_operand.hbm [shape: f32[4,1,128], index: 7, kind: input, shape index: {}]   ;;  %s2527_s8 = inlined_call_operand.hbm [shape: f32[128,128], index: 8, kind: output, shape index: {}]  }
   0x1   :  { %2535 = sst [smem:[#allocation30_spill]] %s2519_s0 }
   0x2   :  { %2536 = sst [smem:[#allocation31_spill]] %s2521_s2 }
   0x3   :  { %2537 = sst [smem:[#allocation32_spill]] %s2523_s4 }
   0x4   :  { %2538 = sst [smem:[#allocation33_spill]] %s2527_s8 }
   0x5   :  { %13 = vsyncpa [#allocation6], 0 }
   0x6   :  { %14 = vsyncpa [#allocation9], 0 }
   0x7   :  { %16 = vsyncpa [#allocation9 + $0x1], 0 }
   0x8   :  { %17 = vsyncpa [#allocation12], 0 }
   0x9   :  { %19 = vsyncpa [#allocation12 + $0x1], 0 }
   0xa   :  { %20 = vsyncpa [#allocation15], 0 }
   0xb   :  { %22 = vsyncpa [#allocation15 + $0x1], 0 }
   0xc   :  { %23 = vsyncpa [#allocation7], 0  ;;  %s2141_s27 = smov 0   ;;  %s2143_s28 = smov 0  }
   0xd   :  { %s2145_s29 = smov 0   ;;  %s2147_s30 = smov 0  }
   0xe LB: > { %2539 = sst [smem:[#allocation27_spill]] %s2082_s29  ;;  %s2162_s9 = sadd.s32 1, %s2086_s30   ;;  %s2086_s30 = sphi %s2147_s30, %s2554_s30   ;;  %s2082_s29 = sphi %s2145_s29, %s2556_s29   ;;  %s2078_s28 = sphi %s2143_s28, %s2558_s28   ;;  %s2074_s27 = sphi %s2141_s27, %s2557_s27  }
   0xf   : > { %2540 = sst [smem:[#allocation28_spill]] %s2162_s9  ;;  %s57_s10 = sadd.s32 1, %s2082_s29 }
  0x10   : > { %s54_s11 = ssub.s32 %s2086_s30, %s2162_s9  ;;  %p64_p0 = scmp.ne.s32.totalorder %s2082_s29, %s2078_s28 }
  0x11   : > { %p55_p1 = scmp.eq.s32.totalorder %s54_s11, 0  ;;  %p65_p2 = scmp.eq.s32.totalorder %s2086_s30, 0 }
  0x12   : > { %p1754_p4 = scmp.lt.s32.totalorder %s2086_s30, 4  ;;  %s2176_s14 = sand.u32 1, %s2082_s29  }
  0x13   : > { %s2171_s12 = scalar_select %p55_p1, %s2082_s29, %s57_s10  }
  0x14   : > { %p66_p3 = por %p65_p2, %p64_p0  ;;  %s1465_s15 = sshll.u32 %s2176_s14, 6 }
  0x15   : > { %2541 = sst [smem:[#allocation29_spill]] %s2171_s12  ;;  %s1610_s16 = sshll.u32 %s2086_s30, 6 }
  0x16   : > { %s2542_s2 = sld [smem:[#allocation31_spill]]  ;;  %s263_s21 = scalar_lea.vmem [#allocation8], %s1465_s15 }
  0x17   : > { %s271_s22 = sshll.u32 %s263_s21, 4  ;;  %p2183_p5 = pnand %p1754_p4, %p66_p3  ;;  %s272_s22 = int_to_ptr.vmem [resolvable:$true] %s271_s22 }
  0x18   : > { %s324_s26 = scalar_lea.hbm %s2524_s5, %s1610_s16  ;;  %s319_s10 = scalar_lea.vmem [#allocation13], %s1465_s15 }
  0x19   : > { %s327_s11 = sshll.u32 %s319_s10, 4  ;;  %s325_s13 = sshll.u32 %s324_s26, 4  ;;  %s2214_s13 = int_to_ptr.hbm [resolvable:$true] %s325_s13  ;;  %s2216_s11 = int_to_ptr.vmem [resolvable:$true] %s327_s11 }
  0x1a   : > { %s2544_s12 = sand.u32 1, %s2086_s30   ;;  %p2196_p7 = pneg %p2183_p5 }
  0x1b   : > { %s2192_s17 = scalar_lea.sflag [#allocation9], %s2544_s12 }
  0x1c   : > { %s268_s19 = scalar_lea.hbm %s2542_s2, %s1610_s16  ;;  %s1809_s24 = scalar_lea.hbm %s2542_s2, 256 }
  0x1d   : > { %s269_s20 = sshll.u32 %s268_s19, 4  ;;  %s270_s20 = int_to_ptr.hbm [resolvable:$true] %s269_s20 }
  0x1e   : > { %s1802_s18 = sshra.s32 %s270_s20, 4  ;;  %s1803_s18 = int_to_ptr.hbm [resolvable:$true] %s1802_s18 }
  0x1f   : > { %s1804_s19 = scalar_lea.hbm %s1803_s18, 64  ;;  %p1810_p10 = scmp.lt.s32.totalorder %s1803_s18, %s2542_s2 }
  0x20   : > { %p1805_p6 = scmp.ne.s32.totalorder %s1803_s18, %s1804_s19  ;;  %p1811_p11 = scmp.lt.s32.totalorder %s1809_s24, %s1804_s19 }
  0x22   : > { %p1807_p8 = pnand %p2196_p7, %p1805_p6  ;;  %p1812_p12 = por %p1811_p11, %p1810_p10 }
  0x24   : > { %p1808_p9 = pneg %p1807_p8 }
  0x26   : > { %p1813_p13 = pnand %p1812_p12, %p1808_p9 }
  0x28   : > { %1816 = shalt.err (!%p1813_p13)
}
  0x29   : > { %s2531_s26 = smov 64   ;;  %s2533_s10 = smov 4  }
  0x2a   : > { %1740 = dma.hbm_to_vmem [thread:$0]  (!%p2183_p5), %s270_s20, 1024, %s272_s22, %s2192_s17, %s2531_s26, %s2531_s26, %s2533_s10  }
  0x2b   : > { %s2546_s4 = sld [smem:[#allocation32_spill]]  ;;  %s301_s15 = scalar_lea.vmem [#allocation11], %s2176_s14 }
  0x2c   : > { %s308_s24 = sshll.u32 %s301_s15, 4  ;;  %s2547_s12 = sand.u32 1, %s2086_s30   ;;  %s309_s24 = int_to_ptr.vmem [resolvable:$true] %s308_s24 }
  0x2d   : > { %s2225_s2 = scalar_lea.sflag [#allocation12], %s2547_s12 }
  0x31   : > { %s304_s16 = scalar_lea.hbm %s2546_s4, %s2086_s30  ;;  %s1839_s18 = scalar_lea.hbm %s2546_s4, 4 }
  0x32   : > { %s306_s25 = sshll.u32 %s304_s16, 4  ;;  %s307_s25 = int_to_ptr.hbm [resolvable:$true] %s306_s25 }
  0x33   : > { %s1832_s29 = sshra.s32 %s307_s25, 4  ;;  %s1833_s29 = int_to_ptr.hbm [resolvable:$true] %s1832_s29 }
  0x34   : > { %s1834_s9 = scalar_lea.hbm %s1833_s29, 1  ;;  %p1840_p3 = scmp.lt.s32.totalorder %s1833_s29, %s2546_s4 }
  0x35   : > { %p1835_p0 = scmp.ne.s32.totalorder %s1833_s29, %s1834_s9  ;;  %p1841_p4 = scmp.lt.s32.totalorder %s1839_s18, %s1834_s9 }
  0x37   : > { %p1837_p1 = pnand %p1835_p0, %p2196_p7  ;;  %p1842_p6 = por %p1841_p4, %p1840_p3 }
  0x39   : > { %p1838_p2 = pneg %p1837_p1 }
  0x3b   : > { %p1843_p8 = pnand %p1842_p6, %p1838_p2 }
  0x3d   : > { %1846 = shalt.err (!%p1843_p8)
}
  0x3e   : > { %1746 = dma.hbm_to_vmem [thread:$0]  (!%p2183_p5), %s307_s25, 16, %s309_s24, %s2225_s2  }
  0x3f   : > { %s2239_s16 = sadd.s32 4294967295, %s2086_s30   ;;  %p70_p9 = scmp.ne.s32.totalorder %s2078_s28, %s2074_s27 }
  0x40   : > { %p71_p10 = scmp.eq.s32.totalorder %s2239_s16, 0  ;;  %p1462_p11 = scmp.ge.s32.totalorder %s2086_s30, 1 }
  0x41   : > { %p232_p12 = scmp.lt.s32.totalorder %s2086_s30, 5  ;;  %p1463_p0 = scmp.ne.s32.totalorder %s2239_s16, 0 }
  0x42   : > { %p2248_p13 = por %p71_p10, %p70_p9  ;;  %s2550_s0 = sld [smem:[#allocation30_spill]] }
  0x43   : > { %p2253_p1 = pnand %p1462_p11, %p232_p12  ;;  %s2090_s27 = smov [#allocation5]  }
  0x44   : > { %s245_s25 = sshll.u32 %s2090_s27, 4  ;;  %s287_s22 = scalar_lea.hbm %s2522_s3, %s2086_s30  ;;  %s246_s25 = int_to_ptr.vmem [resolvable:$true] %s245_s25 }
  0x45   : > { %p1733_p2 = pneg %p2253_p1  ;;  %s289_s18 = sshll.u32 %s287_s22, 4  ;;  %s290_s18 = int_to_ptr.hbm [resolvable:$true] %s289_s18 }
  0x46   : > { %s284_s19 = scalar_lea.vmem [#allocation10], %s2176_s14  ;;  %s2551_s26 = smov 4  }
  0x47   : > { %p1734_p3 = pnand %p1733_p2, %p71_p10  ;;  %s291_s10 = sshll.u32 %s284_s19, 4  ;;  %s292_s10 = int_to_ptr.vmem [resolvable:$true] %s291_s10 }
  0x48   : > { %s243_s24 = sshll.u32 %s2550_s0, 4  ;;  %s2552_s15 = smov 64   ;;  %s244_s24 = int_to_ptr.hbm [resolvable:$true] %s243_s24 }
  0x49   : > { %1736 = dma.hbm_to_vmem [thread:$0]  (!%p1734_p3), %s244_s24, 1024, %s246_s25, [#allocation6], %s2552_s15, %s2552_s15, %s2551_s26  }
  0x4a   : > { %s1892_s0 = sshra.s32 %s290_s18, 4  ;;  %s1899_s12 = scalar_lea.hbm %s2522_s3, 4  ;;  %s1893_s0 = int_to_ptr.hbm [resolvable:$true] %s1892_s0 }
  0x4b   : > { %s1894_s4 = scalar_lea.hbm %s1893_s0, 1  ;;  %p1900_p9 = scmp.lt.s32.totalorder %s1893_s0, %s2522_s3 }
  0x4c   : > { %p1895_p4 = scmp.ne.s32.totalorder %s1893_s0, %s1894_s4  ;;  %p1901_p11 = scmp.lt.s32.totalorder %s1899_s12, %s1894_s4 }
  0x4e   : > { %p1897_p6 = pnand %p1895_p4, %p2196_p7  ;;  %p1902_p12 = por %p1901_p11, %p1900_p9 }
  0x50   : > { %p1898_p8 = pneg %p1897_p6 }
  0x52   : > { %p1903_p2 = pnand %p1902_p12, %p1898_p8 }
  0x54   : > { %1906 = shalt.err (!%p1903_p2)
}
  0x55   : > { %1743 = dma.hbm_to_vmem [thread:$0]  (!%p2183_p5), %s290_s18, 16, %s292_s10, %s2192_s17  }
  0x56   : > { %s1922_s24 = sshra.s32 %s2214_s13, 4  ;;  %s1929_s0 = scalar_lea.hbm %s2524_s5, 256  ;;  %s1923_s24 = int_to_ptr.hbm [resolvable:$true] %s1922_s24 }
  0x57   : > { %s1924_s25 = scalar_lea.hbm %s1923_s24, 64  ;;  %p1930_p8 = scmp.lt.s32.totalorder %s1923_s24, %s2524_s5 }
  0x58   : > { %p1925_p3 = scmp.ne.s32.totalorder %s1923_s24, %s1924_s25  ;;  %p1931_p9 = scmp.lt.s32.totalorder %s1929_s0, %s1924_s25 }
  0x5a   : > { %p1927_p4 = pnand %p1925_p3, %p2196_p7  ;;  %p1932_p11 = por %p1931_p9, %p1930_p8 }
  0x5c   : > { %p1928_p6 = pneg %p1927_p4 }
  0x5e   : > { %p1933_p12 = pnand %p1932_p11, %p1928_p6 }
  0x60   : > { %1936 = shalt.err (!%p1933_p12)
}
  0x61   : > { %1749 = dma.hbm_to_vmem [thread:$0]  (!%p2183_p5), %s2214_s13, 1024, %s2216_s11, %s2225_s2, %s2552_s15, %s2552_s15, %s2551_s26  }
  0x62   : > { %s349_s18 = scalar_lea.hbm %s2526_s7, %s2086_s30  ;;  %s346_s20 = scalar_lea.vmem [#allocation14], %s2176_s14 }
  0x63   : > { %s351_s12 = sshll.u32 %s349_s18, 4  ;;  %s353_s22 = sshll.u32 %s346_s20, 4  ;;  %s352_s12 = int_to_ptr.hbm [resolvable:$true] %s351_s12  ;;  %s354_s22 = int_to_ptr.vmem [resolvable:$true] %s353_s22 }
  0x64   : > { %s344_s24 = scalar_lea.sflag [#allocation15], %s2176_s14  ;;  %s1952_s25 = sshra.s32 %s352_s12, 4  ;;  %s1953_s25 = int_to_ptr.hbm [resolvable:$true] %s1952_s25 }
  0x65   : > { %s1954_s8 = scalar_lea.hbm %s1953_s25, 1  ;;  %s1959_s2 = scalar_lea.hbm %s2526_s7, 4 }
  0x66   : > { %p1955_p2 = scmp.ne.s32.totalorder %s1953_s25, %s1954_s8  ;;  %p1960_p6 = scmp.lt.s32.totalorder %s1953_s25, %s2526_s7 }
  0x67   : > { %p1961_p8 = scmp.lt.s32.totalorder %s1959_s2, %s1954_s8 }
  0x68   : > { %p1957_p3 = pnand %p1955_p2, %p2196_p7 }
  0x69   : > { %p1962_p9 = por %p1961_p8, %p1960_p6 }
  0x6a   : > { %p1958_p4 = pneg %p1957_p3 }
  0x6c   : > { %p1963_p11 = pnand %p1962_p9, %p1958_p4 }
  0x6e   : > { %1966 = shalt.err (!%p1963_p11)
}
  0x6f   : > { %1752 = dma.hbm_to_vmem [thread:$0]  (!%p2183_p5), %s352_s12, 16, %s354_s22, %s344_s24  }
  0x70   : > { %362 = sbr.rel (%p2253_p1) target bundleno = 917 (0x395), region = 48 }
  0x75   : > { %2051 = dma.done.wait (%p71_p10), [#allocation6], 1024  }
  0x76   : > { %2053 = vsyncadd (%p71_p10), [#allocation6], 4294966272  ;;  %s369_s30 = sand.u32 1, %s2239_s16   ;;  %s2324_s14 = sand.u32 1, %s2078_s28  }
  0x77   : > { %s1473_s21 = sshll.u32 %s2324_s14, 6  ;;  %s370_s26 = scalar_lea.sflag [#allocation9], %s369_s30 }
  0x78   : > { %s2327_s23 = scalar_lea.vmem [#allocation8], %s1473_s21 }
  0x79   : > { %2055 = dma.done.wait (%p2248_p13), %s370_s26, 1040  }
  0x7a   : > { %2057 = vsyncadd (%p2248_p13), %s370_s26, 4294966256  ;;  %s382_s9 = scalar_lea.vmem [#allocation10], %s2324_s14  ;;  %s389_s15 = scalar_lea.sflag [#allocation12], %s369_s30 }
  0x7b   : > { %s391_s4 = scalar_lea.vmem [#allocation11], %s2324_s14 }
  0x7c   : > { %2059 = dma.done.wait (%p2248_p13), %s389_s15, 1040  }
  0x7d   : > { %2061 = vsyncadd (%p2248_p13), %s389_s15, 4294966256  ;;  %s2339_s27 = scalar_lea.vmem [#allocation13], %s1473_s21  ;;  %s408_s17 = scalar_lea.sflag [#allocation15], %s2324_s14 }
  0x7e   : > { %s410_s10 = scalar_lea.vmem [#allocation14], %s2324_s14 }
  0x7f   : > { %2063 = dma.done.wait (%p2248_p13), %s408_s17, 16  }
  0x80   : > { %2065 = vsyncadd (%p2248_p13), %s408_s17, 4294967280  ;;  %p457_p5 = scmp.lt.s32.totalorder %s2239_s16, 3  ;;  %463 = sbr.rel (%p1463_p0) target bundleno = 144 (0x90), region = 76 }
  0x81   : > { %s471_s8 = sshll.u32 (!%p1463_p0), %s2520_s1, 4  ;;  %s2091_s29 = smov (!%p1463_p0), [#allocation2]   ;;  %s472_s8 = int_to_ptr.hbm [resolvable:$true] %s471_s8 }
  0x82   : > { %s2349_s18 = scalar_select %p457_p5, %s2239_s16, 3 }
  0x83   : > { %s473_s19 = sshll.u32 (!%p1463_p0), %s2091_s29, 4  ;;  %s474_s19 = int_to_ptr.vmem [resolvable:$true] %s473_s19 }
  0x84   : > { %s459_s22 = scalar_lea.vmem %s2525_s6, %s2349_s18 }
  0x85   : > { %v477_v0 = vld [vmem:[#allocation5] sm:$0xff]   ;;  %v479_v1 = vld [vmem:[#allocation5 + $0x8] sm:$0xff]   ;;  %v481_v2 = vld [vmem:[#allocation5 + $0x10] sm:$0xff]   ;;  %476 = dma.hbm_to_vmem [thread:$0]  %s472_s8, 1024, %s474_s19, [#allocation4] }
  0x86   : > { %493 = vst [vmem:[#allocation3] sm:$0xff] %v477_v0   ;;  %v483_v3 = vld [vmem:[#allocation5 + $0x18] sm:$0xff]   ;;  %v485_v4 = vld [vmem:[#allocation5 + $0x20] sm:$0xff]   ;;  %v487_v5 = vld [vmem:[#allocation5 + $0x28] sm:$0xff]  }
  0x87   : > { %495 = vst [vmem:[#allocation3 + $0x8] sm:$0xff] %v479_v1   ;;  %v489_v6 = vld [vmem:[#allocation5 + $0x30] sm:$0xff]   ;;  %v491_v7 = vld [vmem:[#allocation5 + $0x38] sm:$0xff]  }
  0x88   : > { %497 = vst [vmem:[#allocation3 + $0x10] sm:$0xff] %v481_v2  }
  0x89   : > { %499 = vst [vmem:[#allocation3 + $0x18] sm:$0xff] %v483_v3  }
  0x8a   : > { %501 = vst [vmem:[#allocation3 + $0x20] sm:$0xff] %v485_v4  }
  0x8b   : > { %503 = vst [vmem:[#allocation3 + $0x28] sm:$0xff] %v487_v5  }
  0x8c   : > { %505 = vst [vmem:[#allocation3 + $0x30] sm:$0xff] %v489_v6  }
  0x8d   : > { %507 = vst [vmem:[#allocation3 + $0x38] sm:$0xff] %v491_v7  }
  0x8e   : > { %2066 = dma.done.wait [#allocation4], 1024 }
  0x8f   : > { %2067 = vsyncadd [#allocation4], 4294966272 }
  0x90 PF: > { %v1615_v12 = vld [vmem:[#allocation3 + $0x18] sm:$0xff]  ;;  %v1614_v13 = vld [vmem:[#allocation3 + $0x10] sm:$0xff]  ;;  %v1613_v14 = vld [vmem:[#allocation3 + $0x8] sm:$0xff]  ;;  %p1604_p7 = scmp.ne.s32.totalorder %s2239_s16, 3 }
  0x91   : > { %v1616_v11 = vld [vmem:[#allocation3 + $0x20] sm:$0xff]  ;;  %v1626_v17 = vld [vmem:[#allocation2 + $0x30] sm:$0xff]  ;;  %v1621_v18 = vld [vmem:[#allocation2 + $0x8] sm:$0xff] }
  0x92   : > { %v1617_v10 = vld [vmem:[#allocation3 + $0x28] sm:$0xff]  ;;  %v1612_v15 = vld [vmem:[#allocation3] sm:$0xff]  ;;  %v1627_v19 = vld [vmem:[#allocation2 + $0x38] sm:$0xff] }
  0x93   : > { %v1618_v9 = vld [vmem:[#allocation3 + $0x30] sm:$0xff]  ;;  %v1620_v16 = vld [vmem:[#allocation2] sm:$0xff]  ;;  %v1623_v21 = vld [vmem:[#allocation2 + $0x18] sm:$0xff] }
  0x94   : > { %v1619_v8 = vld [vmem:[#allocation3 + $0x38] sm:$0xff]  ;;  %v1622_v20 = vld [vmem:[#allocation2 + $0x10] sm:$0xff]  ;;  %v1633_v24 = vld [vmem:[%s2327_s23 + $0x28] sm:$0xff] }
  0x95   : > { %641 = vmatpush.bf16.msra.mxu0 %v1619_v8  ;;  %1691 = vmatpush.bf16.msra.mxu3 %v1619_v8  ;;  %v1635_v22 = vld [vmem:[%s2327_s23 + $0x38] sm:$0xff]  ;;  %v1634_v23 = vld [vmem:[%s2327_s23 + $0x30] sm:$0xff]  ;;  %v1632_v25 = vld [vmem:[%s2327_s23 + $0x20] sm:$0xff] }
  0x96   : > { %762 = vmatpush.bf16.msra.mxu1 %v1635_v22  ;;  %v1624_v26 = vld [vmem:[#allocation2 + $0x20] sm:$0xff]  ;;  %v1631_v27 = vld [vmem:[%s2327_s23 + $0x18] sm:$0xff]  ;;  %v1625_v28 = vld [vmem:[#allocation2 + $0x28] sm:$0xff] }
  0x97   : > { %v1630_v29 = vld [vmem:[%s2327_s23 + $0x10] sm:$0xff]  ;;  %v1629_v30 = vld [vmem:[%s2327_s23 + $0x8] sm:$0xff]  ;;  %v1628_v31 = vld [vmem:[%s2327_s23] sm:$0xff] }
  0x99   : > { %642 = vmatpush.bf16.msra.mxu0 %v1618_v9  ;;  %1692 = vmatpush.bf16.msra.mxu3 %v1618_v9 }
  0x9a   : > { %763 = vmatpush.bf16.msra.mxu1 %v1634_v23 }
  0x9d   : > { %643 = vmatpush.bf16.msra.mxu0 %v1617_v10  ;;  %1693 = vmatpush.bf16.msra.mxu3 %v1617_v10 }
  0x9e   : > { %764 = vmatpush.bf16.msra.mxu1 %v1633_v24 }
  0xa1   : > { %644 = vmatpush.bf16.msra.mxu0 %v1616_v11  ;;  %1694 = vmatpush.bf16.msra.mxu3 %v1616_v11 }
  0xa2   : > { %765 = vmatpush.bf16.msra.mxu1 %v1632_v25 }
  0xa5   : > { %645 = vmatpush.bf16.msra.mxu0 %v1615_v12  ;;  %1695 = vmatpush.bf16.msra.mxu3 %v1615_v12 }
  0xa6   : > { %766 = vmatpush.bf16.msra.mxu1 %v1631_v27 }
  0xa9   : > { %646 = vmatpush.bf16.msra.mxu0 %v1614_v13  ;;  %1696 = vmatpush.bf16.msra.mxu3 %v1614_v13 }
  0xaa   : > { %767 = vmatpush.bf16.msra.mxu1 %v1630_v29 }
  0xad   : > { %647 = vmatpush.bf16.msra.mxu0 %v1613_v14  ;;  %1697 = vmatpush.bf16.msra.mxu3 %v1613_v14 }
  0xae   : > { %768 = vmatpush.bf16.msra.mxu1 %v1629_v30 }
  0xb1   : > { %648 = vmatpush.bf16.msra.mxu0 %v1612_v15  ;;  %1698 = vmatpush.bf16.msra.mxu3 %v1612_v15 }
  0xb2   : > { %769 = vmatpush.bf16.msra.mxu1 %v1628_v31 }
  0xb4   : > { %649 = vmatmul.bf16.vlgmr.msra.gmra.mxu0 %v1620_v16  ;;  %679 = vmatmul.bf16.vlgmr.msra.gmra.mxu3 %v1626_v17 }
  0xb5   : > { %1699 = vmatpush.bf16.msrb.mxu3 %v1635_v22 }
  0xb9   : > { %1700 = vmatpush.bf16.msrb.mxu3 %v1634_v23 }
  0xbd   : > { %1701 = vmatpush.bf16.msrb.mxu3 %v1633_v24 }
  0xc1   : > { %1702 = vmatpush.bf16.msrb.mxu3 %v1632_v25 }
  0xc4   : > { %654 = vmatmul.bf16.gmra.mxu0 %v1621_v18  ;;  %684 = vmatmul.bf16.gmra.mxu3 %v1627_v19 }
  0xc5   : > { %1703 = vmatpush.bf16.msrb.mxu3 %v1631_v27 }
  0xc9   : > { %1704 = vmatpush.bf16.msrb.mxu3 %v1630_v29 }
  0xcd   : > { %1705 = vmatpush.bf16.msrb.mxu3 %v1629_v30 }
  0xd1   : > { %1706 = vmatpush.bf16.msrb.mxu3 %v1628_v31 }
  0xd4   : > { %659 = vmatmul.bf16.gmra.mxu0 %v1622_v20 }
  0xe4   : > { %664 = vmatmul.bf16.gmra.mxu0 %v1623_v21 }
  0xf4   : > { %669 = vmatmul.bf16.gmra.mxu0 %v1624_v26 }
 0x104   : > { %674 = vmatmul.bf16.gmra.mxu0 %v1625_v28 }
 0x131   : > { %v650_v32 = vpop.f32.mrf.mxu0 }
 0x137   : > { %v680_v36 = vpop.f32.mrf.mxu3 }
 0x139   : > { %v652_v33 = vpop.f32.mrf.mxu0 }
 0x13a   : > { %v690_v34 = vpack.c.bf16 %v652_v33, %v650_v32 }
 0x13c   : > { %770 = vmatmul.bf16.vlgmr.msra.gmra.mxu1 %v690_v34 }
 0x13f   : > { %v682_v39 = vpop.f32.mrf.mxu3 }
 0x140   : > { %v696_v40 = vpack.c.bf16 %v682_v39, %v680_v36 }
 0x141   : > { %v655_v35 = vpop.f32.mrf.mxu0 }
 0x142   : > { %800 = vmatmul.bf16.vlgmr.msrb.gmra.mxu3 %v696_v40 }
 0x147   : > { %v685_v42 = vpop.f32.mrf.mxu3 }
 0x149   : > { %v657_v37 = vpop.f32.mrf.mxu0 }
 0x14a   : > { %v691_v38 = vpack.c.bf16 %v657_v37, %v655_v35  ;;  %v1643_v37 = vld [vmem:[%s2339_s27 + $0x38] sm:$0xff] }
 0x14b   : > { %1065 = vmatpush.bf16.msra.mxu2 %v1643_v37  ;;  %1707 = vmatpush.bf16.msra.mxu3 %v1643_v37 }
 0x14c   : > { %775 = vmatmul.bf16.gmra.mxu1 %v691_v38 }
 0x14f   : > { %v687_v45 = vpop.f32.mrf.mxu3 }
 0x150   : > { %v697_v46 = vpack.c.bf16 %v687_v45, %v685_v42 }
 0x151   : > { %v660_v41 = vpop.f32.mrf.mxu0 }
 0x152   : > { %805 = vmatmul.bf16.gmra.mxu3 %v697_v46 }
 0x159   : > { %v662_v43 = vpop.f32.mrf.mxu0 }
 0x15a   : > { %v692_v44 = vpack.c.bf16 %v662_v43, %v660_v41 }
 0x15c   : > { %780 = vmatmul.bf16.gmra.mxu1 %v692_v44  ;;  %v1642_v44 = vld [vmem:[%s2339_s27 + $0x30] sm:$0xff] }
 0x15d   : > { %1066 = vmatpush.bf16.msra.mxu2 %v1642_v44  ;;  %1708 = vmatpush.bf16.msra.mxu3 %v1642_v44 }
 0x161   : > { %v665_v47 = vpop.f32.mrf.mxu0 }
 0x169   : > { %v667_v48 = vpop.f32.mrf.mxu0 }
 0x16a   : > { %v693_v49 = vpack.c.bf16 %v667_v48, %v665_v47 }
 0x16c   : > { %785 = vmatmul.bf16.gmra.mxu1 %v693_v49 }
 0x171   : > { %v670_v50 = vpop.f32.mrf.mxu0 }
 0x179   : > { %v672_v51 = vpop.f32.mrf.mxu0 }
 0x17a   : > { %v694_v52 = vpack.c.bf16 %v672_v51, %v670_v50 }
 0x17c   : > { %790 = vmatmul.bf16.gmra.mxu1 %v694_v52  ;;  %v1641_v52 = vld [vmem:[%s2339_s27 + $0x28] sm:$0xff] }
 0x17d   : > { %1067 = vmatpush.bf16.msra.mxu2 %v1641_v52  ;;  %1709 = vmatpush.bf16.msra.mxu3 %v1641_v52 }
 0x181   : > { %v675_v53 = vpop.f32.mrf.mxu0 }
 0x189   : > { %v677_v54 = vpop.f32.mrf.mxu0 }
 0x18a   : > { %v695_v55 = vpack.c.bf16 %v677_v54, %v675_v53 }
 0x18c   : > { %795 = vmatmul.bf16.gmra.mxu1 %v695_v55 }
 0x1b9   : > { %v2368_v56 = vpop.f32.mrf.mxu1 }
 0x1ba   : > { %v833_v3 = vmul.f32 %v2368_v56, %v2368_v56 }
 0x1c1   : > { %v2370_v57 = vpop.f32.mrf.mxu1 }
 0x1c2   : > { %v834_v2 = vmul.f32 %v2370_v57, %v2370_v57  ;;  %v811_v4 = vadd.f32 %v2370_v57, %v2368_v56 }
 0x1c4   : > { %v849_v6 = vadd.f32 %v834_v2, %v833_v3 }
 0x1c5   : > { %v801_v0 = vpop.f32.mrf.mxu3 }
 0x1c6   : > { %v845_v41 = vmul.f32 %v801_v0, %v801_v0 }
 0x1c9   : > { %v2372_v58 = vpop.f32.mrf.mxu1 }
 0x1ca   : > { %v835_v5 = vmul.f32 %v2372_v58, %v2372_v58  ;;  %v812_v7 = vadd.f32 %v811_v4, %v2372_v58 }
 0x1cc   : > { %v850_v10 = vadd.f32 %v849_v6, %v835_v5  ;;  %v1638_v6 = vld [vmem:[%s2339_s27 + $0x10] sm:$0xff] }
 0x1cd   : > { %v803_v13 = vpop.f32.mrf.mxu3 }
 0x1ce   : > { %v846_v45 = vmul.f32 %v803_v13, %v803_v13 }
 0x1d1   : > { %v2374_v59 = vpop.f32.mrf.mxu1 }
 0x1d2   : > { %v836_v8 = vmul.f32 %v2374_v59, %v2374_v59  ;;  %v813_v11 = vadd.f32 %v812_v7, %v2374_v59 }
 0x1d4   : > { %v851_v14 = vadd.f32 %v850_v10, %v836_v8 }
 0x1d5   : > { %v806_v30 = vpop.f32.mrf.mxu3 }
 0x1d6   : > { %v847_v49 = vmul.f32 %v806_v30, %v806_v30 }
 0x1d9   : > { %v781_v60 = vpop.f32.mrf.mxu1 }
 0x1da   : > { %v837_v12 = vmul.f32 %v781_v60, %v781_v60  ;;  %v814_v15 = vadd.f32 %v813_v11, %v781_v60  ;;  %v1640_v60 = vld [vmem:[%s2339_s27 + $0x20] sm:$0xff]  ;;  %v1637_v11 = vld [vmem:[%s2339_s27 + $0x8] sm:$0xff] }
 0x1db   : > { %1068 = vmatpush.bf16.msra.mxu2 %v1640_v60  ;;  %1710 = vmatpush.bf16.msra.mxu3 %v1640_v60 }
 0x1dc   : > { %v852_v17 = vadd.f32 %v851_v14, %v837_v12 }
 0x1dd   : > { %v808_v48 = vpop.f32.mrf.mxu3 }
 0x1de   : > { %v848_v53 = vmul.f32 %v808_v48, %v808_v48 }
 0x1e1   : > { %v783_v61 = vpop.f32.mrf.mxu1 }
 0x1e2   : > { %v838_v16 = vmul.f32 %v783_v61, %v783_v61  ;;  %v815_v18 = vadd.f32 %v814_v15, %v783_v61 }
 0x1e4   : > { %v853_v20 = vadd.f32 %v852_v17, %v838_v16  ;;  %v1636_v16 = vld [vmem:[%s2339_s27] sm:$0xff] }
 0x1e9   : > { %v786_v62 = vpop.f32.mrf.mxu1 }
 0x1ea   : > { %v839_v19 = vmul.f32 %v786_v62, %v786_v62  ;;  %v816_v21 = vadd.f32 %v815_v18, %v786_v62 }
 0x1ec   : > { %v854_v24 = vadd.f32 %v853_v20, %v839_v19 }
 0x1f1   : > { %v788_v63 = vpop.f32.mrf.mxu1 }
 0x1f2   : > { %v840_v22 = vmul.f32 %v788_v63, %v788_v63  ;;  %v817_v25 = vadd.f32 %v816_v21, %v788_v63 }
 0x1f4   : > { %v855_v27 = vadd.f32 %v854_v24, %v840_v22 }
 0x1f9   : > { %v791_v1 = vpop.f32.mrf.mxu1 }
 0x1fa   : > { %v841_v26 = vmul.f32 %v791_v1, %v791_v1  ;;  %v818_v28 = vadd.f32 %v817_v25, %v791_v1  ;;  %v1639_v1 = vld [vmem:[%s2339_s27 + $0x18] sm:$0xff] }
 0x1fb   : > { %1069 = vmatpush.bf16.msra.mxu2 %v1639_v1  ;;  %1711 = vmatpush.bf16.msra.mxu3 %v1639_v1  ;;  %v874_v25 = vld [vmem:[%s382_s9] sm:$0x1] }
 0x1fc   : > { %v856_v31 = vadd.f32 %v855_v27, %v841_v26 }
 0x1ff   : > { %1070 = vmatpush.bf16.msra.mxu2 %v1638_v6  ;;  %1712 = vmatpush.bf16.msra.mxu3 %v1638_v6 }
 0x201   : > { %v793_v9 = vpop.f32.mrf.mxu1 }
 0x202   : > { %v842_v29 = vmul.f32 %v793_v9, %v793_v9  ;;  %v819_v32 = vadd.f32 %v818_v28, %v793_v9  ;;  %v2092_v28 = vmov 0.0|0.0  }
 0x203   : > { %1071 = vmatpush.bf16.msra.mxu2 %v1637_v11  ;;  %1713 = vmatpush.bf16.msra.mxu3 %v1637_v11 }
 0x204   : > { %v857_v34 = vadd.f32 %v856_v31, %v842_v29 }
 0x207   : > { %1072 = vmatpush.bf16.msra.mxu2 %v1636_v16  ;;  %1714 = vmatpush.bf16.msra.mxu3 %v1636_v16 }
 0x209   : > { %v796_v23 = vpop.f32.mrf.mxu1 }
 0x20a   : > { %v843_v33 = vmul.f32 %v796_v23, %v796_v23  ;;  %v820_v35 = vadd.f32 %v819_v32, %v796_v23  ;;  %1103 = vmatmul.bf16.vlgmr.msra.gmra.mxu3 %v2092_v28 }
 0x20c   : > { %v858_v38 = vadd.f32 %v857_v34, %v843_v33 }
 0x211   : > { %v798_v36 = vpop.f32.mrf.mxu1 }
 0x212   : > { %v821_v39 = vadd.f32 %v820_v35, %v798_v36  ;;  %v844_v40 = vmul.f32 %v798_v36, %v798_v36 }
 0x214   : > { %v822_v42 = vadd.f32 %v821_v39, %v801_v0  ;;  %v859_v43 = vadd.f32 %v858_v38, %v844_v40 }
 0x216   : > { %v823_v46 = vadd.f32 %v822_v42, %v803_v13  ;;  %v860_v47 = vadd.f32 %v859_v43, %v845_v41 }
 0x218   : > { %v824_v50 = vadd.f32 %v823_v46, %v806_v30  ;;  %v861_v51 = vadd.f32 %v860_v47, %v846_v45  ;;  %v887_v30 = vld [vmem:[%s391_s4] sm:$0x1] }
 0x21a   : > { %v825_v54 = vadd.f32 %v824_v50, %v808_v48  ;;  %v862_v55 = vadd.f32 %v861_v51, %v847_v49  ;;  %1108 = vmatmul.bf16.gmra.mxu3 %v2092_v28 }
 0x21c   : > { %v826_v61 = vrot.slane %v825_v54, 4  ;;  %v863_v62 = vadd.f32 %v862_v55, %v848_v53 }
 0x21e   : > { %v827_v63 = vadd.f32 %v826_v61, %v825_v54  ;;  %v864_v0 = vrot.slane %v863_v62, 4 }
 0x220   : > { %v828_v2 = vrot.slane %v827_v63, 2  ;;  %v865_v3 = vadd.f32 %v864_v0, %v863_v62 }
 0x222   : > { %v829_v4 = vadd.f32 %v828_v2, %v827_v63  ;;  %v866_v5 = vrot.slane %v865_v3, 2 }
 0x224   : > { %v830_v7 = vrot.slane %v829_v4, 1  ;;  %v867_v8 = vadd.f32 %v866_v5, %v865_v3 }
 0x226   : > { %v831_v9 = vadd.f32 %v830_v7, %v829_v4  ;;  %v868_v10 = vrot.slane %v867_v8, 1 }
 0x228   : > { %v832_v12 = vmul.f32 0.03125, %v831_v9  ;;  %v869_v13 = vadd.f32 %v868_v10, %v867_v8 }
 0x22a   : > { %v870_v14 = vmul.f32 0.03125, %v869_v13  ;;  %v871_v15 = vmul.f32 %v832_v12, %v832_v12 }
 0x22c   : > { %v872_v17 = vsub.f32 %v870_v14, %v871_v15 }
 0x22e   : > { %v873_v18 = vmax.f32 %v872_v17, 0.0 }
 0x230   : > { %v875_v19 = vadd.f32 1e-05, %v873_v18 }
 0x232   : > { %1798 = vrsqrt.f32 %v875_v19  ;;  %vm882_vm1 = vweird.f32 %v875_v19 }
 0x238   : > { %v1799_v20 = vpop.eup %1798 }
 0x239   : > { %v877_v21 = vmul.f32 %v1799_v20, %v875_v19  ;;  %vm883_vm0 = vweird.f32 %v1799_v20 }
 0x23a   : > { %vm884_vm2 = vmor %vm882_vm1, %vm883_vm0 }
 0x23b   : > { %v878_v22 = vmul.f32 %v1799_v20, %v877_v21 }
 0x23d   : > { %v879_v23 = vmul.f32 0.5, %v878_v22 }
 0x23f   : > { %v880_v24 = vsub.f32 1.5, %v879_v23 }
 0x241   : > { %v881_v26 = vmul.f32 %v1799_v20, %v880_v24 }
 0x243   : > { %v885_v27 = vsel %vm884_vm2, %v1799_v20, %v881_v26 }
 0x244   : > { %v886_v29 = vmul.f32 %v885_v27, %v874_v25 }
 0x246   : > { %v888_v31 = vmul.f32 %v886_v29, %v832_v12  ;;  %v891_v32 = vperm.slane %v886_v29, 0 }
 0x248   : > { %v889_v33 = vsub.f32 %v887_v30, %v888_v31  ;;  %v893_v34 = vmul.f32 %v891_v32, %v2368_v56  ;;  %v894_v35 = vmul.f32 %v891_v32, %v2370_v57  ;;  %v895_v42 = vmul.f32 %v891_v32, %v2372_v58 }
 0x249   : > { %v896_v43 = vmul.f32 %v891_v32, %v2374_v59 }
 0x24a   : > { %v910_v36 = vperm.slane %v889_v33, 0 }
 0x24c   : > { %v912_v37 = vadd.f32 %v910_v36, %v893_v34  ;;  %v913_v38 = vadd.f32 %v910_v36, %v894_v35  ;;  %v914_v44 = vadd.f32 %v910_v36, %v895_v42  ;;  %v915_v45 = vadd.f32 %v910_v36, %v896_v43 }
 0x24e   : > { %v928_v39 = vmax.f32 %v912_v37, 0.0  ;;  %v929_v40 = vmax.f32 %v913_v38, 0.0  ;;  %v930_v46 = vmax.f32 %v914_v44, 0.0  ;;  %v931_v47 = vmax.f32 %v915_v45, 0.0 }
 0x250   : > { %v993_v41 = vpack.c.bf16 %v929_v40, %v928_v39  ;;  %v994_v48 = vpack.c.bf16 %v931_v47, %v930_v46 }
 0x252   : > { %1073 = vmatmul.bf16.vlgmr.msra.gmra.mxu2 %v993_v41 }
 0x262   : > { %1078 = vmatmul.bf16.gmra.mxu2 %v994_v48 }
 0x272   : > { %1083 = vmatmul.bf16.gmra.mxu2 %v2092_v28 }
 0x282   : > { %1088 = vmatmul.bf16.gmra.mxu2 %v2092_v28 }
 0x28d   : > { %v2422_v54 = vpop.f32.mrf.mxu3 }
 0x28e   : > { %v1148_v33 = vmul.f32 %v2422_v54, %v2422_v54 }
 0x292   : > { %1093 = vmatmul.bf16.gmra.mxu2 %v2092_v28 }
 0x295   : > { %v2440_v6 = vpop.f32.mrf.mxu3 }
 0x296   : > { %v1149_v36 = vmul.f32 %v2440_v6, %v2440_v6 }
 0x29d   : > { %v2459_v23 = vpop.f32.mrf.mxu3 }
 0x29e   : > { %v1150_v40 = vmul.f32 %v2459_v23, %v2459_v23 }
 0x2a2   : > { %1098 = vmatmul.bf16.gmra.mxu2 %v2092_v28 }
 0x2a5   : > { %v1111_v39 = vpop.f32.mrf.mxu3 }
 0x2a6   : > { %v1151_v44 = vmul.f32 %v1111_v39, %v1111_v39 }
 0x2d5   : > { %v2404_v56 = vpop.f32.mrf.mxu2 }
 0x2d6   : > { %v1136_v60 = vmul.f32 %v2404_v56, %v2404_v56 }
 0x2dd   : > { %v2406_v57 = vpop.f32.mrf.mxu2 }
 0x2de   : > { %v1137_v55 = vmul.f32 %v2406_v57, %v2406_v57  ;;  %v1114_v61 = vadd.f32 %v2406_v57, %v2404_v56 }
 0x2e0   : > { %v1152_v63 = vadd.f32 %v1137_v55, %v1136_v60 }
 0x2e5   : > { %v2408_v49 = vpop.f32.mrf.mxu2 }
 0x2e6   : > { %v1138_v62 = vmul.f32 %v2408_v49, %v2408_v49  ;;  %v1115_v0 = vadd.f32 %v1114_v61, %v2408_v49 }
 0x2e8   : > { %v1153_v3 = vadd.f32 %v1152_v63, %v1138_v62 }
 0x2ed   : > { %v2410_v50 = vpop.f32.mrf.mxu2 }
 0x2ee   : > { %v1139_v1 = vmul.f32 %v2410_v50, %v2410_v50  ;;  %v1116_v4 = vadd.f32 %v1115_v0, %v2410_v50 }
 0x2f0   : > { %v1154_v7 = vadd.f32 %v1153_v3, %v1139_v1 }
 0x2f5   : > { %v2412_v58 = vpop.f32.mrf.mxu2 }
 0x2f6   : > { %v1140_v5 = vmul.f32 %v2412_v58, %v2412_v58  ;;  %v1117_v8 = vadd.f32 %v1116_v4, %v2412_v58 }
 0x2f8   : > { %v1155_v10 = vadd.f32 %v1154_v7, %v1140_v5 }
 0x2fd   : > { %v2414_v59 = vpop.f32.mrf.mxu2 }
 0x2fe   : > { %v1141_v9 = vmul.f32 %v2414_v59, %v2414_v59  ;;  %v1118_v11 = vadd.f32 %v1117_v8, %v2414_v59 }
 0x300   : > { %v1156_v13 = vadd.f32 %v1155_v10, %v1141_v9 }
 0x305   : > { %v2416_v51 = vpop.f32.mrf.mxu2 }
 0x306   : > { %v1142_v12 = vmul.f32 %v2416_v51, %v2416_v51  ;;  %v1119_v14 = vadd.f32 %v1118_v11, %v2416_v51 }
 0x308   : > { %v1157_v17 = vadd.f32 %v1156_v13, %v1142_v12 }
 0x30d   : > { %v2418_v52 = vpop.f32.mrf.mxu2 }
 0x30e   : > { %v1143_v15 = vmul.f32 %v2418_v52, %v2418_v52  ;;  %v1120_v18 = vadd.f32 %v1119_v14, %v2418_v52 }
 0x310   : > { %v1158_v20 = vadd.f32 %v1157_v17, %v1143_v15 }
 0x315   : > { %v2420_v53 = vpop.f32.mrf.mxu2 }
 0x316   : > { %v1144_v19 = vmul.f32 %v2420_v53, %v2420_v53  ;;  %v1121_v21 = vadd.f32 %v1120_v18, %v2420_v53 }
 0x318   : > { %v1159_v24 = vadd.f32 %v1158_v20, %v1144_v19  ;;  %v1177_v19 = vld [vmem:[%s459_s22] sm:$0x1] }
 0x31d   : > { %v2435_v2 = vpop.f32.mrf.mxu2 }
 0x31e   : > { %v1145_v22 = vmul.f32 %v2435_v2, %v2435_v2  ;;  %v1122_v25 = vadd.f32 %v1121_v21, %v2435_v2 }
 0x320   : > { %v1160_v27 = vadd.f32 %v1159_v24, %v1145_v22  ;;  %v1190_v24 = vld [vmem:[%s410_s10] sm:$0x1] }
 0x325   : > { %v2451_v16 = vpop.f32.mrf.mxu2 }
 0x326   : > { %v1146_v26 = vmul.f32 %v2451_v16, %v2451_v16  ;;  %v1123_v28 = vadd.f32 %v1122_v25, %v2451_v16 }
 0x328   : > { %v1161_v30 = vadd.f32 %v1160_v27, %v1146_v26 }
 0x32d   : > { %v2465_v29 = vpop.f32.mrf.mxu2 }
 0x32e   : > { %v1124_v31 = vadd.f32 %v1123_v28, %v2465_v29  ;;  %v1147_v32 = vmul.f32 %v2465_v29, %v2465_v29 }
 0x330   : > { %v1125_v34 = vadd.f32 %v1124_v31, %v2422_v54  ;;  %v1162_v35 = vadd.f32 %v1161_v30, %v1147_v32 }
 0x332   : > { %v1163_v37 = vadd.f32 %v1162_v35, %v1148_v33  ;;  %v1126_v38 = vadd.f32 %v1125_v34, %v2440_v6 }
 0x334   : > { %v1127_v41 = vadd.f32 %v1126_v38, %v2459_v23  ;;  %v1164_v42 = vadd.f32 %v1163_v37, %v1149_v36 }
 0x336   : > { %v1128_v43 = vadd.f32 %v1127_v41, %v1111_v39  ;;  %v1165_v45 = vadd.f32 %v1164_v42, %v1150_v40 }
 0x338   : > { %v1129_v46 = vrot.slane %v1128_v43, 4  ;;  %v1166_v47 = vadd.f32 %v1165_v45, %v1151_v44 }
 0x33a   : > { %v1130_v48 = vadd.f32 %v1129_v46, %v1128_v43  ;;  %v1167_v55 = vrot.slane %v1166_v47, 4 }
 0x33c   : > { %v1131_v60 = vrot.slane %v1130_v48, 2  ;;  %v1168_v61 = vadd.f32 %v1167_v55, %v1166_v47 }
 0x33e   : > { %v1132_v62 = vadd.f32 %v1131_v60, %v1130_v48  ;;  %v1169_v63 = vrot.slane %v1168_v61, 2 }
 0x340   : > { %v1133_v0 = vrot.slane %v1132_v62, 1  ;;  %v1170_v1 = vadd.f32 %v1169_v63, %v1168_v61 }
 0x342   : > { %v1134_v3 = vadd.f32 %v1133_v0, %v1132_v62  ;;  %v1171_v4 = vrot.slane %v1170_v1, 1 }
 0x344   : > { %v1135_v5 = vmul.f32 0.03125, %v1134_v3  ;;  %v1172_v7 = vadd.f32 %v1171_v4, %v1170_v1 }
 0x346   : > { %v1173_v8 = vmul.f32 0.03125, %v1172_v7  ;;  %v1174_v9 = vmul.f32 %v1135_v5, %v1135_v5 }
 0x348   : > { %v1175_v10 = vsub.f32 %v1173_v8, %v1174_v9 }
 0x34a   : > { %v1176_v11 = vmax.f32 %v1175_v10, 0.0 }
 0x34c   : > { %v1178_v12 = vadd.f32 1e-05, %v1176_v11 }
 0x34e   : > { %1800 = vrsqrt.f32 %v1178_v12  ;;  %vm1185_vm4 = vweird.f32 %v1178_v12 }
 0x354   : > { %v1801_v13 = vpop.eup %1800 }
 0x355   : > { %v1180_v14 = vmul.f32 %v1801_v13, %v1178_v12  ;;  %vm1186_vm3 = vweird.f32 %v1801_v13 }
 0x356   : > { %vm1187_vm5 = vmor %vm1185_vm4, %vm1186_vm3 }
 0x357   : > { %v1181_v15 = vmul.f32 %v1801_v13, %v1180_v14 }
 0x359   : > { %v1182_v17 = vmul.f32 0.5, %v1181_v15 }
 0x35b   : > { %v1183_v18 = vsub.f32 1.5, %v1182_v17 }
 0x35d   : > { %v1184_v20 = vmul.f32 %v1801_v13, %v1183_v18 }
 0x35f   : > { %v1188_v21 = vsel %vm1187_vm5, %v1801_v13, %v1184_v20 }
 0x360   : > { %v1189_v22 = vmul.f32 %v1188_v21, %v1177_v19 }
 0x362   : > { %v1191_v25 = vmul.f32 %v1189_v22, %v1135_v5  ;;  %v1194_v26 = vperm.slane %v1189_v22, 0 }
 0x364   : > { %v1192_v27 = vsub.f32 %v1190_v24, %v1191_v25  ;;  %v1196_v28 = vmul.f32 %v1194_v26, %v2404_v56  ;;  %v1197_v30 = vmul.f32 %v1194_v26, %v2406_v57  ;;  %v1198_v31 = vmul.f32 %v1194_v26, %v2408_v49 }
 0x365   : > { %v1199_v32 = vmul.f32 %v1194_v26, %v2410_v50  ;;  %v1200_v33 = vmul.f32 %v1194_v26, %v2412_v58  ;;  %v1201_v34 = vmul.f32 %v1194_v26, %v2414_v59  ;;  %v1202_v35 = vmul.f32 %v1194_v26, %v2416_v51 }
 0x366   : > { %v1203_v36 = vmul.f32 %v1194_v26, %v2418_v52  ;;  %v1204_v37 = vmul.f32 %v1194_v26, %v2420_v53  ;;  %v1205_v38 = vmul.f32 %v1194_v26, %v2435_v2  ;;  %v1206_v56 = vmul.f32 %v1194_v26, %v2451_v16 }
 0x367   : > { %v1207_v57 = vmul.f32 %v1194_v26, %v2465_v29  ;;  %v1213_v40 = vperm.slane %v1192_v27, 0  ;;  %v1208_v49 = vmul.f32 %v1194_v26, %v2422_v54  ;;  %v1209_v50 = vmul.f32 %v1194_v26, %v2440_v6 }
 0x368   : > { %v1210_v58 = vmul.f32 %v1194_v26, %v2459_v23  ;;  %v1211_v59 = vmul.f32 %v1194_v26, %v1111_v39 }
 0x369   : > { %v1215_v41 = vadd.f32 %v1213_v40, %v1196_v28  ;;  %v1216_v51 = vadd.f32 %v1213_v40, %v1197_v30  ;;  %v1217_v42 = vadd.f32 %v1213_v40, %v1198_v31  ;;  %v1218_v52 = vadd.f32 %v1213_v40, %v1199_v32 }
 0x36a   : > { %v1219_v43 = vadd.f32 %v1213_v40, %v1200_v33  ;;  %v1220_v53 = vadd.f32 %v1213_v40, %v1201_v34  ;;  %v1221_v44 = vadd.f32 %v1213_v40, %v1202_v35  ;;  %v1222_v2 = vadd.f32 %v1213_v40, %v1203_v36 }
 0x36b   : > { %v1223_v45 = vadd.f32 %v1213_v40, %v1204_v37  ;;  %v1224_v16 = vadd.f32 %v1213_v40, %v1205_v38  ;;  %v1225_v46 = vadd.f32 %v1213_v40, %v1206_v56  ;;  %v1226_v29 = vadd.f32 %v1213_v40, %v1207_v57 }
 0x36c   : > { %v1227_v47 = vadd.f32 %v1213_v40, %v1208_v49  ;;  %v1228_v48 = vadd.f32 %v1213_v40, %v1209_v50  ;;  %v1229_v54 = vadd.f32 %v1213_v40, %v1210_v58  ;;  %v1230_v55 = vadd.f32 %v1213_v40, %v1211_v59 }
 0x36d   : > { %v1231_v6 = vmax.f32 %v1215_v41, 0.0  ;;  %v1232_v60 = vmax.f32 %v1216_v51, 0.0  ;;  %v1233_v23 = vmax.f32 %v1217_v42, 0.0  ;;  %v1234_v39 = vmax.f32 %v1218_v52, 0.0 }
 0x36e   : > { %v1235_v61 = vmax.f32 %v1219_v43, 0.0  ;;  %v1236_v62 = vmax.f32 %v1220_v53, 0.0  ;;  %v1237_v63 = vmax.f32 %v1221_v44, 0.0  ;;  %v1238_v0 = vmax.f32 %v1222_v2, 0.0 }
 0x36f   : > { %v1239_v1 = vmax.f32 %v1223_v45, 0.0  ;;  %v1240_v3 = vmax.f32 %v1224_v16, 0.0  ;;  %v1241_v4 = vmax.f32 %v1225_v46, 0.0  ;;  %v1242_v5 = vmax.f32 %v1226_v29, 0.0 }
 0x370   : > { %v1243_v7 = vmax.f32 %v1227_v47, 0.0  ;;  %v1244_v8 = vmax.f32 %v1228_v48, 0.0  ;;  %v1647_v9 = vpack.c.bf16 %v1232_v60, %v1231_v6  ;;  %v1652_v10 = vpack.c.bf16 %v1234_v39, %v1233_v23 }
 0x371   : > { %v1657_v11 = vpack.c.bf16 %v1236_v62, %v1235_v61  ;;  %v1245_v12 = vmax.f32 %v1229_v54, 0.0  ;;  %v1246_v13 = vmax.f32 %v1230_v55, 0.0  ;;  %v1662_v14 = vpack.c.bf16 %v1238_v0, %v1237_v63 }
 0x372   : > { %1648 = vst [vmem:[#allocation3] sm:$0xff] %v1647_v9   ;;  %v1667_v15 = vpack.c.bf16 %v1240_v3, %v1239_v1  ;;  %v1672_v17 = vpack.c.bf16 %v1242_v5, %v1241_v4  ;;  %v1677_v18 = vpack.c.bf16 %v1244_v8, %v1243_v7 }
 0x373   : > { %1684 = vst [vmem:[#allocation3 + $0x8] sm:$0xff] %v1652_v10   ;;  %v1682_v19 = vpack.c.bf16 %v1246_v13, %v1245_v12 }
 0x374   : > { %1685 = vst [vmem:[#allocation3 + $0x10] sm:$0xff] %v1657_v11  }
 0x375   : > { %1686 = vst [vmem:[#allocation3 + $0x18] sm:$0xff] %v1662_v14   ;;  %1282 = sbr.rel (%p1604_p7) target bundleno = 906 (0x38a), region = 84 }
 0x376   : > { %1687 = vst [vmem:[#allocation3 + $0x20] sm:$0xff] %v1667_v15  }
 0x377   : > { %1688 = vst [vmem:[#allocation3 + $0x28] sm:$0xff] %v1672_v17  }
 0x378   : > { %1689 = vst [vmem:[#allocation3 + $0x30] sm:$0xff] %v1677_v18  }
 0x379   : > { %1690 = vst [vmem:[#allocation3 + $0x38] sm:$0xff] %v1682_v19  }
 0x37a   : > { %1283 = vst [vmem:[#allocation16] sm:$0xff] %v1231_v6 }
 0x37b   : > { %1284 = vst [vmem:[#allocation16 + $0x8] sm:$0xff] %v1232_v60 }
 0x37c   : > { %1285 = vst [vmem:[#allocation16 + $0x10] sm:$0xff] %v1233_v23 }
 0x37d   : > { %1286 = vst [vmem:[#allocation16 + $0x18] sm:$0xff] %v1234_v39 }
 0x37e   : > { %1287 = vst [vmem:[#allocation16 + $0x20] sm:$0xff] %v1235_v61 }
 0x37f   : > { %1288 = vst [vmem:[#allocation16 + $0x28] sm:$0xff] %v1236_v62 }
 0x380   : > { %1289 = vst [vmem:[#allocation16 + $0x30] sm:$0xff] %v1237_v63 }
 0x381   : > { %1290 = vst [vmem:[#allocation16 + $0x38] sm:$0xff] %v1238_v0 }
 0x382   : > { %1291 = vst [vmem:[#allocation16 + $0x40] sm:$0xff] %v1239_v1 }
 0x383   : > { %1292 = vst [vmem:[#allocation16 + $0x48] sm:$0xff] %v1240_v3 }
 0x384   : > { %1293 = vst [vmem:[#allocation16 + $0x50] sm:$0xff] %v1241_v4 }
 0x385   : > { %1294 = vst [vmem:[#allocation16 + $0x58] sm:$0xff] %v1242_v5 }
 0x386   : > { %1295 = vst [vmem:[#allocation16 + $0x60] sm:$0xff] %v1243_v7 }
 0x387   : > { %1296 = vst [vmem:[#allocation16 + $0x68] sm:$0xff] %v1244_v8 }
 0x388   : > { %1297 = vst [vmem:[#allocation16 + $0x70] sm:$0xff] %v1245_v12 }
 0x389   : > { %1298 = vst [vmem:[#allocation16 + $0x78] sm:$0xff] %v1246_v13 }
 0x38a PF: > { %p1756_p10 = scmp.eq.s32.totalorder %s2239_s16, 3  ;;  %s2093_s13 = smov [#allocation16]  }
 0x38b   : > { %s1304_s11 = sshll.u32 %s2093_s13, 4  ;;  %s2553_s21 = sld [smem:[#allocation33_spill]]  ;;  %s1305_s11 = int_to_ptr.vmem [resolvable:$true] %s1304_s11 }
 0x38c   : > { %s2094_s23 = smov 128   ;;  %s2095_s9 = smov 8  }
 0x391   : > { %s1306_s26 = sshll.u32 %s2553_s21, 4  ;;  %s1307_s26 = int_to_ptr.hbm [resolvable:$true] %s1306_s26 }
 0x392   : > { %1730 = dma.vmem_to_hbm [thread:$0]  (%p1756_p10), %s1305_s11, 2048, %s1307_s26, [#allocation7], %s2094_s23, %s2094_s23, %s2095_s9  }
 0x393   : > { %2069 = dma.done.wait (%p1756_p10), [#allocation7], 2048  }
 0x394   : > { %2071 = vsyncadd (%p1756_p10), [#allocation7], 4294965248 }
 0x395 PF: > { %s2554_s30 = sld [smem:[#allocation28_spill]]  ;;  %s2557_s27 = smov %s2078_s28 }
 0x396   : > { %s2555_s15 = sld [smem:[#allocation27_spill]] }
 0x397   : > { %s2556_s29 = sld [smem:[#allocation29_spill]] }
 0x39b   : > { %p26_p13 = scmp.ge.s32.totalorder %s2554_s30, 6  }
 0x39c   : > { %s2558_s28 = smov %s2555_s15 }
 0x39d   :  { %28 = sbr.rel (!%p26_p13) target bundleno = 14 (0xe), region = 153 }
 0x3a2   :  { %1323 = vsyncpa [#allocation6], 1 }
 0x3a3   :  { %1325 = vsyncpa [#allocation6 + $0x1], 1 }
 0x3a4   :  { %1326 = vsyncpa [#allocation9], 1 }
 0x3a5   :  { %1328 = vsyncpa [#allocation9 + $0x1], 1 }
 0x3a6   :  { %1329 = vsyncpa [#allocation12], 1 }
 0x3a7   :  { %1331 = vsyncpa [#allocation12 + $0x1], 1 }
 0x3a8   :  { %1332 = vsyncpa [#allocation15], 1 }
 0x3a9   :  { %1334 = vsyncpa [#allocation15 + $0x1], 1 }
 0x3aa   :  { %1335 = vsyncpa [#allocation7], 1 }
 0x3ab   :  { %1337 = vsyncpa [#allocation7 + $0x1], 1 }
 0x3ac   :  { %1338 = vsyncmov [#allocation4] }
 0x3af   :  { %s1339_s16 = vpop.sfrf %1338 }
 0x3b0   :  { %p1609_p0 = scmp.ne.s32.totalorder %s1339_s16, 0 }
 0x3b2   :  { %1343 = shalt.err (%p1609_p0)  }

</bundles_post_ra>
